<compile_context>
chip_gen: v7x
topology: tpu7x:2x2x1
jax: 0.10.0
libtpu: 0.0.40
codegen_flags: <defaults>
</compile_context>

<pallas_src>
import functools

import numpy as np
import jax
import jax.numpy as jnp
from jax.experimental import pallas as pl
from jax.experimental.pallas import tpu as pltpu


LANE_TILE = 32768          # max lane tile (multiple of 128)
MIN_M_PAD = 512            # smallest padded edge-count bucket


def _round_up(x: int, m: int) -> int:
    return ((x + m - 1) // m) * m


def _next_pow2(x: int) -> int:
    return 1 << max(0, int(x - 1).bit_length())


def _bucket_m_pad(m: int) -> int:
    """Pad the crossed-edge count to a small set of power-of-two buckets."""
    m128 = _round_up(max(int(m), 1), 128)
    return max(MIN_M_PAD, _next_pow2(m128))


def _pick_tile(m_pad: int) -> int:
    # >= 4 grid steps (keeps both v7x TensorCores fed via "parallel"),
    # capped at LANE_TILE lanes (amortizes per-step overhead on v5e/v6e).
    # m_pad and LANE_TILE are powers of two, so the tile always divides m_pad.
    return max(128, min(LANE_TILE, m_pad // 4))


# ----------------------------------------------------------------------------
# Pallas kernels: fused (deform + edge interpolation), lane-dense layout
# ----------------------------------------------------------------------------
def _interp_deform_kernel(ga_ref, gb_ref, s_ref, da_ref, db_ref, out_ref, *,
                          scale):
    sa = s_ref[0:1, :]                       # (1, TILE)
    sb = s_ref[1:2, :]
    # fused normalize_grid_deformation: p = grid + (range/res) * tanh(offset)
    pa = ga_ref[...] + scale * jnp.tanh(da_ref[...])     # (3, TILE)
    pb = gb_ref[...] + scale * jnp.tanh(db_ref[...])
    denom = sa - sb                          # nonzero for real crossing edges
    denom = jnp.where(denom == 0.0, jnp.float32(1.0), denom)   # padded lanes
    inv = pl.reciprocal(denom, approx=True)
    inv = inv * (2.0 - denom * inv)          # one Newton step -> near-exact
    # verts = pa * (-sb)/(sa-sb) + pb * sa/(sa-sb)
    out_ref[...] = pa * (-sb * inv) + pb * (sa * inv)


def _interp_kernel(ga_ref, gb_ref, s_ref, out_ref):
    sa = s_ref[0:1, :]
    sb = s_ref[1:2, :]
    pa = ga_ref[...]
    pb = gb_ref[...]
    denom = sa - sb
    denom = jnp.where(denom == 0.0, jnp.float32(1.0), denom)
    inv = pl.reciprocal(denom, approx=True)
    inv = inv * (2.0 - denom * inv)
    out_ref[...] = pa * (-sb * inv) + pb * (sa * inv)


def _edge_spec(rows: int, tile: int) -> pl.BlockSpec:
    # rows (2 or 3) equals the full sublane extent of the array; tile is a
    # multiple of 128 on the lane axis -> every vld/vst is lane-dense.
    return pl.BlockSpec((rows, tile), lambda i: (0, i))


def pallas_edge_interp(ga, gb, sab, da=None, db=None, *, tile, scale=0.0):
    """ga/gb/(da/db): (3, M_pad) f32; sab: (2, M_pad) f32 -> (3, M_pad) f32."""
    _, m_pad = ga.shape
    assert m_pad % tile == 0 and tile % 128 == 0
    with_deform = da is not None
    if with_deform:
        kernel = functools.partial(_interp_deform_kernel,
                                   scale=np.float32(scale))
        operands = (ga, gb, sab, da, db)
        in_specs = [_edge_spec(3, tile), _edge_spec(3, tile),
                    _edge_spec(2, tile), _edge_spec(3, tile),
                    _edge_spec(3, tile)]
        cost = pl.CostEstimate(flops=30 * m_pad, transcendentals=7 * m_pad,
                               bytes_accessed=68 * m_pad)
    else:
        kernel = _interp_kernel
        operands = (ga, gb, sab)
        in_specs = [_edge_spec(3, tile), _edge_spec(3, tile),
                    _edge_spec(2, tile)]
        cost = pl.CostEstimate(flops=18 * m_pad, transcendentals=1 * m_pad,
                               bytes_accessed=44 * m_pad)
    return pl.pallas_call(
        kernel,
        out_shape=jax.ShapeDtypeStruct((3, m_pad), jnp.float32),
        grid=(m_pad // tile,),
        in_specs=in_specs,
        out_specs=_edge_spec(3, tile),
        compiler_params=pltpu.CompilerParams(
            dimension_semantics=("parallel",),
            vmem_limit_bytes=32 * 1024 * 1024,
        ),
        cost_estimate=cost,
    )(*operands)


# ----------------------------------------------------------------------------
# Jitted device float path: row gathers + fused Pallas interp (one jit each,
# keyed on the static (tile,) / (tile, scale) and the bucketed m_pad shape).
# ----------------------------------------------------------------------------
@functools.partial(jax.jit, static_argnames=("tile", "scale"))
def _device_verts_deform(grid_vertices, sdf_flat, deformation, idx_a, idx_b, *,
                         tile, scale):
    # Row gathers of only the 2M surface endpoints (contiguous 12B rows),
    # O(M) transposes of the small gathered slabs, then the fused kernel.
    defo = deformation.astype(jnp.float32)
    ga = jnp.take(grid_vertices, idx_a, axis=0).T        # (3, m_pad)
    gb = jnp.take(grid_vertices, idx_b, axis=0).T
    da = jnp.take(defo, idx_a, axis=0).T
    db = jnp.take(defo, idx_b, axis=0).T
    sab = jnp.stack([jnp.take(sdf_flat, idx_a),
                     jnp.take(sdf_flat, idx_b)], axis=0)  # (2, m_pad)
    out = pallas_edge_interp(ga, gb, sab, da, db, tile=tile, scale=scale)
    return out.T                                          # (m_pad, 3)


@functools.partial(jax.jit, static_argnames=("tile",))
def _device_verts(grid_vertices, sdf_flat, idx_a, idx_b, *, tile):
    ga = jnp.take(grid_vertices, idx_a, axis=0).T
    gb = jnp.take(grid_vertices, idx_b, axis=0).T
    sab = jnp.stack([jnp.take(sdf_flat, idx_a),
                     jnp.take(sdf_flat, idx_b)], axis=0)
    out = pallas_edge_interp(ga, gb, sab, tile=tile)
    return out.T


# ----------------------------------------------------------------------------
# Deterministic synthetic tet grid (replaces the .npz the torch module loads)
# ----------------------------------------------------------------------------
def build_tet_grid(resolution: int):
    R = resolution
    rng = np.arange(R + 1)
    I, J, K = np.meshgrid(rng, rng, rng, indexing="ij")
    verts = (np.stack([I, J, K], -1).reshape(-1, 3).astype(np.float32)) / R

    def vid(i, j, k):
        return (i * (R + 1) + j) * (R + 1) + k

    corner_off = [(0, 0, 0), (1, 0, 0), (1, 1, 0), (0, 1, 0),
                  (0, 0, 1), (1, 0, 1), (1, 1, 1), (0, 1, 1)]
    cube_tets = [(0, 1, 2, 6), (0, 2, 3, 6), (0, 3, 7, 6),
                 (0, 7, 4, 6), (0, 4, 5, 6), (0, 5, 1, 6)]
    tets = []
    for i in range(R):
        for j in range(R):
            for k in range(R):
                c = [vid(i + di, j + dj, k + dk) for (di, dj, dk) in corner_off]
                for t in cube_tets:
                    tets.append([c[t[0]], c[t[1]], c[t[2]], c[t[3]]])
    return verts, np.asarray(tets, dtype=np.int32)


# ----------------------------------------------------------------------------
# MarchingTetrahedraHelper (JAX / Pallas)
# ----------------------------------------------------------------------------
class MarchingTetrahedraHelper:
    points_range = (0.0, 1.0)

    TRIANGLE_TABLE = np.asarray(
        [[-1, -1, -1, -1, -1, -1], [1, 0, 2, -1, -1, -1], [4, 0, 3, -1, -1, -1],
         [1, 4, 2, 1, 3, 4], [3, 1, 5, -1, -1, -1], [2, 3, 0, 2, 5, 3],
         [1, 4, 0, 1, 5, 4], [4, 2, 5, -1, -1, -1], [4, 5, 2, -1, -1, -1],
         [4, 1, 0, 4, 5, 1], [3, 2, 0, 3, 5, 2], [1, 3, 5, -1, -1, -1],
         [4, 1, 2, 4, 3, 1], [3, 0, 4, -1, -1, -1], [2, 0, 1, -1, -1, -1],
         [-1, -1, -1, -1, -1, -1]], dtype=np.int32)
    NUM_TRIANGLES_TABLE = np.asarray(
        [0, 1, 1, 2, 1, 2, 2, 1, 1, 2, 2, 1, 2, 1, 1, 0], dtype=np.int32)
    BASE_TET_EDGES = np.asarray(
        [0, 1, 0, 2, 0, 3, 1, 2, 1, 3, 2, 3], dtype=np.int32)

    def __init__(self, resolution: int, grid_vertices: np.ndarray,
                 indices: np.ndarray):
        self.resolution = resolution
        gv = np.asarray(grid_vertices, np.float32)               # (Nv, 3)
        self._grid_vertices = jnp.asarray(gv)                    # device-resident
        self.indices = np.asarray(indices, np.int32)             # (Nt, 4)
        self._last_interp_v = np.zeros((0, 2), np.int32)         # debug/testing

    @property
    def grid_vertices(self):
        return self._grid_vertices

    def normalize_grid_deformation(self, offsets):
        # Reference implementation; the actual compute is fused in the kernel.
        return (self.points_range[1] - self.points_range[0]) / self.resolution \
            * jnp.tanh(offsets)

    # ------------------------------------------------------------------
    def _forward(self, sdf_n: jnp.ndarray, deformation, tet_fx4: np.ndarray):
        scale = (self.points_range[1] - self.points_range[0]) / self.resolution

        # SDF stays on device; only an occupancy bitmask crosses D->H.
        sdf_dev = jnp.reshape(jnp.asarray(sdf_n, jnp.float32), (-1,))   # (N,)

        # ---- integer / boolean bookkeeping on host (dynamic shapes) -------
        # TODO(synk): torch.unique / boolean compaction / variable face count
        #             have no static-shape Pallas equivalent; kept in numpy.
        occ_n = np.asarray(sdf_dev > 0)                             # (N,) bool
        occ_fx4 = occ_n[tet_fx4.reshape(-1)].reshape(-1, 4)         # (Nt, 4)
        occ_sum = occ_fx4.sum(-1)
        valid_tets = (occ_sum > 0) & (occ_sum < 4)

        all_edges = tet_fx4[valid_tets][:, self.BASE_TET_EDGES].reshape(-1, 2)
        all_edges = np.sort(all_edges, axis=1)                      # (min, max)
        unique_edges, idx_map = np.unique(all_edges, axis=0, return_inverse=True)
        idx_map = idx_map.reshape(-1).astype(np.int32)

        mask_edges = occ_n[unique_edges.reshape(-1)].reshape(-1, 2).sum(-1) == 1
        mapping = np.full((unique_edges.shape[0],), -1, dtype=np.int32)
        mapping[mask_edges] = np.arange(int(mask_edges.sum()), dtype=np.int32)
        idx_map = mapping[idx_map]
        interp_v = unique_edges[mask_edges].astype(np.int32)        # (M, 2)
        M = interp_v.shape[0]
        self._last_interp_v = interp_v

        # ---- float hot path: fused deform + SDF interpolation (Pallas) ----
        if M > 0:
            m_pad = _bucket_m_pad(M)
            tile = _pick_tile(m_pad)

            idx_a = np.zeros((m_pad,), np.int32)
            idx_b = np.zeros((m_pad,), np.int32)
            idx_a[:M] = interp_v[:, 0]
            idx_b[:M] = interp_v[:, 1]
            idx_a = jnp.asarray(idx_a)
            idx_b = jnp.asarray(idx_b)

            if deformation is not None:
                out = _device_verts_deform(
                    self._grid_vertices, sdf_dev, jnp.asarray(deformation),
                    idx_a, idx_b, tile=tile, scale=float(scale))
            else:
                out = _device_verts(self._grid_vertices, sdf_dev,
                                    idx_a, idx_b, tile=tile)
            verts = out[:M]                                         # (M, 3)
        else:
            verts = jnp.zeros((0, 3), jnp.float32)

        # ---- face assembly (host numpy, table gathers) ---------------------
        idx_map6 = idx_map.reshape(-1, 6)
        v_id = 2 ** np.arange(4, dtype=np.int32)
        tetindex = (occ_fx4[valid_tets].astype(np.int32) * v_id[None, :]).sum(-1)
        num_triangles = self.NUM_TRIANGLES_TABLE[tetindex]

        sel1 = num_triangles == 1
        sel2 = num_triangles == 2
        faces1 = np.take_along_axis(
            idx_map6[sel1], self.TRIANGLE_TABLE[tetindex[sel1]][:, :3], axis=1
        ).reshape(-1, 3)
        faces2 = np.take_along_axis(
            idx_map6[sel2], self.TRIANGLE_TABLE[tetindex[sel2]][:, :6], axis=1
        ).reshape(-1, 3)
        faces = np.concatenate([faces1, faces2], axis=0).astype(np.int32)

        return verts, jnp.asarray(faces, jnp.int32)

    # ------------------------------------------------------------------
    def forward(self, level: jnp.ndarray, deformation=None):
        # Deformation (grid + scale*tanh(offset)) is fused into the interp
        # kernel over the 2M surface endpoints only, never over the full grid.
        v_pos, t_pos_idx = self._forward(level, deformation, self.indices)
        return v_pos, t_pos_idx


# ----------------------------------------------------------------------------
if __name__ == "__main__":
    resolution = 4
    verts_np, tets_np = build_tet_grid(resolution)          # (125, 3), (384, 4)
    helper = MarchingTetrahedraHelper(resolution, verts_np, tets_np)

    N = verts_np.shape[0]
    key = jax.random.PRNGKey(0)
    k1, k2 = jax.random.split(key)

    # sphere-ish SDF so the iso-surface crosses some tets, plus noise
    base_sdf = 0.35 - np.linalg.norm(verts_np - 0.5, axis=-1, keepdims=True)
    level = jnp.asarray(base_sdf, jnp.float32) \
        + 0.02 * jax.random.normal(k1, (N, 1), dtype=jnp.float32)
    deformation = 0.5 * jax.random.normal(k2, (N, 3), dtype=jnp.float32)

    sdf_host = np.asarray(level, np.float32).reshape(-1)
    defo_host = np.asarray(deformation, np.float32)
    scale = 1.0 / resolution

    # ---- with deformation (fused tanh path) ----
    v_pos, t_pos_idx = helper.forward(level, deformation)
    jax.block_until_ready(v_pos)
    jax.block_until_ready(t_pos_idx)
    assert v_pos.ndim == 2 and v_pos.shape[1] == 3 and v_pos.shape[0] > 0
    assert t_pos_idx.ndim == 2 and t_pos_idx.shape[1] == 3
    assert bool(jnp.all(jnp.isfinite(v_pos)))

    iv = helper._last_interp_v
    pos_def = verts_np + scale * np.tanh(defo_host)
    pa, pb = pos_def[iv[:, 0]], pos_def[iv[:, 1]]
    sa, sb = sdf_host[iv[:, 0]][:, None], sdf_host[iv[:, 1]][:, None]
    ref = pa * (-sb / (sa - sb)) + pb * (sa / (sa - sb))
    np.testing.assert_allclose(np.asarray(v_pos), ref, rtol=2e-3, atol=2e-4)

    # ---- without deformation (pure interpolation path) ----
    v_pos2, t_pos_idx2 = helper.forward(level, None)
    jax.block_until_ready(v_pos2)
    jax.block_until_ready(t_pos_idx2)
    assert v_pos2.shape == v_pos.shape
    assert t_pos_idx2.shape == t_pos_idx.shape
    assert bool(jnp.all(jnp.isfinite(v_pos2)))

    iv2 = helper._last_interp_v
    pa2, pb2 = verts_np[iv2[:, 0]], verts_np[iv2[:, 1]]
    sa2, sb2 = sdf_host[iv2[:, 0]][:, None], sdf_host[iv2[:, 1]][:, None]
    ref2 = pa2 * (-sb2 / (sa2 - sb2)) + pb2 * (sa2 / (sa2 - sb2))
    np.testing.assert_allclose(np.asarray(v_pos2), ref2, rtol=2e-3, atol=2e-4)

    print("KERNEL_OK")
</pallas_src>

<mosaic_0001>
module attributes {stable_mosaic.version = 11 : i64} {
  func.func @_interp_deform_kernel(%arg0: i32, %arg1: memref<3x128xf32, #tpu.memory_space<vmem>>, %arg2: memref<3x128xf32, #tpu.memory_space<vmem>>, %arg3: memref<2x128xf32, #tpu.memory_space<vmem>>, %arg4: memref<3x128xf32, #tpu.memory_space<vmem>>, %arg5: memref<3x128xf32, #tpu.memory_space<vmem>>, %arg6: memref<3x128xf32, #tpu.memory_space<vmem>>) attributes {dimension_semantics = [#tpu.dimension_semantics<parallel>], iteration_bounds = array<i64: 4>, scalar_prefetch = 0 : i64, scratch_operands = 0 : i64, tpu.core_type = #tpu.core_type<tc>, window_params = [{transform_indices = @transform_0, window_bounds = array<i64: 3, 128>}, {transform_indices = @transform_1, window_bounds = array<i64: 3, 128>}, {transform_indices = @transform_2, window_bounds = array<i64: 2, 128>}, {transform_indices = @transform_3, window_bounds = array<i64: 3, 128>}, {transform_indices = @transform_4, window_bounds = array<i64: 3, 128>}, {transform_indices = @transform_5, window_bounds = array<i64: 3, 128>}]} {
    %c0 = arith.constant 0 : index
    %c0_0 = arith.constant 0 : index
    %0 = vector.load %arg3[%c0, %c0_0] : memref<2x128xf32, #tpu.memory_space<vmem>>, vector<1x128xf32>
    %c1 = arith.constant 1 : index
    %c0_1 = arith.constant 0 : index
    %1 = vector.load %arg3[%c1, %c0_1] : memref<2x128xf32, #tpu.memory_space<vmem>>, vector<1x128xf32>
    %c0_2 = arith.constant 0 : index
    %c0_3 = arith.constant 0 : index
    %2 = vector.load %arg1[%c0_2, %c0_3] : memref<3x128xf32, #tpu.memory_space<vmem>>, vector<3x128xf32>
    %c0_4 = arith.constant 0 : index
    %c0_5 = arith.constant 0 : index
    %3 = vector.load %arg4[%c0_4, %c0_5] : memref<3x128xf32, #tpu.memory_space<vmem>>, vector<3x128xf32>
    %4 = math.tanh %3 : vector<3x128xf32>
    %cst = arith.constant 2.500000e-01 : f32
    %5 = vector.broadcast %cst : f32 to vector<3x128xf32>
    %6 = arith.mulf %5, %4 : vector<3x128xf32>
    %7 = arith.addf %2, %6 : vector<3x128xf32>
    %c0_6 = arith.constant 0 : index
    %c0_7 = arith.constant 0 : index
    %8 = vector.load %arg2[%c0_6, %c0_7] : memref<3x128xf32, #tpu.memory_space<vmem>>, vector<3x128xf32>
    %c0_8 = arith.constant 0 : index
    %c0_9 = arith.constant 0 : index
    %9 = vector.load %arg5[%c0_8, %c0_9] : memref<3x128xf32, #tpu.memory_space<vmem>>, vector<3x128xf32>
    %10 = math.tanh %9 : vector<3x128xf32>
    %cst_10 = arith.constant 2.500000e-01 : f32
    %11 = vector.broadcast %cst_10 : f32 to vector<3x128xf32>
    %12 = arith.mulf %11, %10 : vector<3x128xf32>
    %13 = arith.addf %8, %12 : vector<3x128xf32>
    %14 = arith.subf %0, %1 : vector<1x128xf32>
    %cst_11 = arith.constant 0.000000e+00 : f32
    %15 = vector.broadcast %cst_11 : f32 to vector<1x128xf32>
    %16 = arith.cmpf oeq, %14, %15 : vector<1x128xf32>
    %cst_12 = arith.constant 1.000000e+00 : f32
    %17 = vector.broadcast %cst_12 : f32 to vector<1x128xf32>
    %18 = arith.select %16, %17, %14 : vector<1x128xi1>, vector<1x128xf32>
    %19 = tpu.reciprocal %18 {approx = true} : vector<1x128xf32> -> vector<1x128xf32>
    %20 = arith.mulf %18, %19 : vector<1x128xf32>
    %cst_13 = arith.constant 2.000000e+00 : f32
    %21 = vector.broadcast %cst_13 : f32 to vector<1x128xf32>
    %22 = arith.subf %21, %20 : vector<1x128xf32>
    %23 = arith.mulf %19, %22 : vector<1x128xf32>
    %cst_14 = arith.constant 0.000000e+00 : f32
    %24 = vector.broadcast %cst_14 : f32 to vector<1x128xf32>
    %25 = arith.subf %24, %1 : vector<1x128xf32>
    %26 = arith.mulf %25, %23 : vector<1x128xf32>
    %27 = vector.broadcast %26 : vector<1x128xf32> to vector<3x128xf32>
    %28 = arith.mulf %7, %27 : vector<3x128xf32>
    %29 = arith.mulf %0, %23 : vector<1x128xf32>
    %30 = vector.broadcast %29 : vector<1x128xf32> to vector<3x128xf32>
    %31 = arith.mulf %13, %30 : vector<3x128xf32>
    %32 = arith.addf %28, %31 : vector<3x128xf32>
    %c0_15 = arith.constant 0 : index
    %c0_16 = arith.constant 0 : index
    %33 = vector.load %arg6[%c0_15, %c0_16] : memref<3x128xf32, #tpu.memory_space<vmem>>, vector<3x128xf32>
    tpu.vector_store %arg6[%c0_15, %c0_16], %32 {strides = array<i32>} : memref<3x128xf32, #tpu.memory_space<vmem>>, vector<3x128xf32>,
    return
  }
  func.func @transform_0(%arg0: i32) -> (i32, i32) {
    %c0_i32 = arith.constant 0 : i32
    %c0_i32_0 = arith.constant 0 : i32
    return %c0_i32, %arg0 : i32, i32
  }
  func.func @transform_1(%arg0: i32) -> (i32, i32) {
    %c0_i32 = arith.constant 0 : i32
    %c0_i32_0 = arith.constant 0 : i32
    return %c0_i32, %arg0 : i32, i32
  }
  func.func @transform_2(%arg0: i32) -> (i32, i32) {
    %c0_i32 = arith.constant 0 : i32
    %c0_i32_0 = arith.constant 0 : i32
    return %c0_i32, %arg0 : i32, i32
  }
  func.func @transform_3(%arg0: i32) -> (i32, i32) {
    %c0_i32 = arith.constant 0 : i32
    %c0_i32_0 = arith.constant 0 : i32
    return %c0_i32, %arg0 : i32, i32
  }
  func.func @transform_4(%arg0: i32) -> (i32, i32) {
    %c0_i32 = arith.constant 0 : i32
    %c0_i32_0 = arith.constant 0 : i32
    return %c0_i32, %arg0 : i32, i32
  }
  func.func @transform_5(%arg0: i32) -> (i32, i32) {
    %c0_i32 = arith.constant 0 : i32
    %c0_i32_0 = arith.constant 0 : i32
    return %c0_i32, %arg0 : i32, i32
  }
}

</mosaic_0001>

<bundles_post_ra>
// kernel: _device_verts_deform.1
= control target key start
LH: loop header
LB: loop body
LE: loop exit
PB: predicated region body
PF: predicated region fallthrough
CT: control target
= control target key end

     0   :  { %10 = vsyncpa [#allocation3], 0  ;;  %s715_s0 = inlined_call_operand.vmem [shape: f32[3,512], index: 0, kind: input, shape index: {}]   ;;  %s716_s1 = inlined_call_operand.vmem [shape: f32[3,512], index: 1, kind: input, shape index: {}]   ;;  %s717_s2 = inlined_call_operand.vmem [shape: f32[2,512], index: 2, kind: input, shape index: {}]   ;;  %s718_s3 = inlined_call_operand.vmem [shape: f32[3,512], index: 3, kind: input, shape index: {}]   ;;  %s719_s4 = inlined_call_operand.vmem [shape: f32[3,512], index: 4, kind: input, shape index: {}]   ;;  %s720_s5 = inlined_call_operand.hbm [shape: f32[3,512], index: 5, kind: output, shape index: {}]  }
   0x1   :  { %12 = vsyncpa [#allocation3 + $0x1], 0  ;;  %s597_s18 = smov 0   ;;  %s599_s19 = smov 0  }
   0x2   :  { %s601_s20 = smov 0   ;;  %s603_s21 = smov 0  }
   0x3 LB: > { %s618_s22 = sadd.s32 4294967295, %s564_s21   ;;  %s443_s23 = sadd.s32 4294967294, %s564_s21   ;;  %s564_s21 = sphi %s603_s21, %s726_s21   ;;  %s560_s20 = sphi %s601_s20, %s725_s20   ;;  %s556_s19 = sphi %s599_s19, %s724_s19   ;;  %s552_s18 = sphi %s597_s18, %s723_s18  }
   0x4   : > { %s622_s24 = sadd.s32 1, %s564_s21   ;;  %s155_s25 = sadd.s32 1, %s560_s20 }
   0x5   : > { %s152_s26 = ssub.s32 %s564_s21, %s622_s24  ;;  %p165_p0 = scmp.ne.s32.totalorder %s560_s20, %s556_s19 }
   0x6   : > { %p153_p1 = scmp.eq.s32.totalorder %s152_s26, 0  ;;  %p166_p2 = scmp.eq.s32.totalorder %s618_s22, 3 }
   0x7   : > { %p171_p3 = scmp.ne.s32.totalorder %s556_s19, %s552_s18  ;;  %p172_p4 = scmp.eq.s32.totalorder %s443_s23, 3 }
   0x8   : > { %s633_s27 = scalar_select %p153_p1, %s560_s20, %s155_s25  }
   0x9   : > { %p635_p5 = por %p166_p2, %p165_p0  ;;  %p639_p6 = por %p172_p4, %p171_p3 }
   0xa   : > { %p446_p7 = scmp.ge.s32.totalorder %s564_s21, 1  ;;  %p225_p8 = scmp.lt.s32.totalorder %s564_s21, 5 }
   0xc   : > { %p226_p9 = pnand %p446_p7, %p225_p8 }
   0xd   : > { %p268_p10 = scmp.lt.s32.totalorder (!%p226_p9), %s618_s22, 3  ;;  %v309_v6 = vlaneseq (!%p226_p9)  ;;  %s265_s17 = sand.u32 (!%p226_p9), 1, %s556_s19  }
   0xe   : > { %229 = sbr.rel (%p226_p9) target bundleno = 69 (0x45), region = 40  ;;  %s447_s9 = sshll.u32 (!%p226_p9), %s265_s17, 2 }
   0xf   : > { %v310_v11 = vshrl.u32 (!%p226_p9), %v309_v6, 7  ;;  %s454_s11 = sshll.u32 (!%p226_p9), %s618_s22, 6  ;;  %s323_s15 = scalar_lea.sflag (!%p226_p9), [#allocation3], %s265_s17 }
  0x10   : > { %s675_s14 = scalar_lea.hbm (!%p226_p9), %s720_s5, %s454_s11 }
  0x11   : > { %v311_v19 = vsub.s32 (!%p226_p9), 0, %v310_v11 }
  0x15   : > { %s269_s30 = scalar_select %p268_p10, %s618_s22, 3 }
  0x16   : > { %s566_s22 = smov [#allocation2]  }
  0x17   : > { %s647_s6 = sshll.u32 %s269_s30, 2  ;;  %s450_s7 = sshll.u32 %s269_s30, 1 }
  0x18   : > { %s279_s10 = scalar_lea.vmem %s717_s2, %s450_s7  ;;  %s283_s13 = scalar_lea.vmem %s718_s3, %s647_s6 }
  0x19   : > { %s287_s16 = scalar_lea.vmem %s719_s4, %s647_s6  ;;  %v288_v0 = vld [vmem:[%s279_s10] sm:$0x1]  ;;  %v289_v1 = vld [vmem:[%s279_s10 + $0x1] sm:$0x1]  ;;  %s271_s26 = scalar_lea.vmem %s715_s0, %s647_s6 }
  0x1a   : > { %v291_v2 = vld [vmem:[%s283_s13] sm:$0x7]  ;;  %v300_v4 = vsub.f32 %v288_v0, %v289_v1  ;;  %s275_s8 = scalar_lea.vmem %s716_s1, %s647_s6  ;;  %v307_v15 = vsub.f32 0.0, %v289_v1  ;;  %s267_s6 = scalar_lea.vmem [#allocation2], %s447_s9 }
  0x1b   : > { %v296_v3 = vld [vmem:[%s287_s16] sm:$0x7]  ;;  %496 = vtanh.f32 %v291_v2  ;;  %s336_s10 = sshll.u32 %s267_s6, 4  ;;  %s506_s23 = sshll.u32 %s566_s22, 4  ;;  %s670_s10 = int_to_ptr.vmem [resolvable:$true] %s336_s10  ;;  %s507_s23 = int_to_ptr.vmem [resolvable:$false] %s506_s23 }
  0x1c   : > { %vm301_vm0 = vcmp.eq.f32.partialorder %v300_v4, 0.0  ;;  %498 = vtanh.f32 %v296_v3  ;;  %v290_v16 = vld [vmem:[%s271_s26] sm:$0x7]  ;;  %s502_s16 = scalar_lea.vmem %s670_s10, 64  ;;  %s508_s25 = scalar_lea.vmem %s507_s23, 128 }
  0x1d   : > { %v302_v5 = vsel %vm301_vm0, 1.0, %v300_v4  ;;  %v295_v17 = vld [vmem:[%s275_s8] sm:$0x7]  ;;  %p503_p11 = scmp.ne.s32.totalorder %s670_s10, %s502_s16  ;;  %p509_p0 = scmp.lt.s32.totalorder %s670_s10, %s507_s23 }
  0x1e   : > { %500 = vrcp.f32 %v302_v5  ;;  %p510_p1 = scmp.lt.s32.totalorder %s508_s25, %s502_s16 }
  0x1f   : > { %p504_p12 = pnand %p503_p11, %p635_p5 }
  0x20   : > { %p511_p2 = por %p510_p1, %p509_p0 }
  0x21   : > { %p505_p13 = pneg %p504_p12 }
  0x23   : > { %p512_p3 = pnand %p511_p2, %p505_p13 }
  0x25   : > { %v497_v7 = vpop.eup %496 }
  0x26   : > { %v499_v8 = vpop.eup %498  ;;  %v293_v12 = vmul.f32 0.25, %v497_v7 }
  0x27   : > { %v298_v13 = vmul.f32 0.25, %v499_v8 }
  0x28   : > { %v501_v9 = vpop.eup %500  ;;  %v294_v20 = vadd.f32 %v293_v12, %v290_v16 }
  0x29   : > { %v304_v10 = vmul.f32 %v501_v9, %v302_v5  ;;  %v299_v21 = vadd.f32 %v298_v13, %v295_v17 }
  0x2b   : > { %v305_v14 = vsub.f32 2.0, %v304_v10 }
  0x2d   : > { %v306_v18 = vmul.f32 %v501_v9, %v305_v14 }
  0x2f   : > { %v308_v22 = vmul.f32 %v307_v15, %v306_v18  ;;  %v314_v23 = vmul.f32 %v306_v18, %v288_v0 }
  0x31   : > { %v312_v24 = vrot.slane %v308_v22, %v311_v19  ;;  %v318_v25 = vrot.slane %v314_v23, %v311_v19 }
  0x33   : > { %v313_v26 = vmul.f32 %v312_v24, %v294_v20  ;;  %v319_v27 = vmul.f32 %v318_v25, %v299_v21 }
  0x35   : > { %v320_v28 = vadd.f32 %v319_v27, %v313_v26 }
  0x37   : > { %321 = vst [vmem:[%s267_s6] sm:$0x7] %v320_v28 }
  0x38   : > { %515 = shalt.err (!%p512_p3)
}
  0x39   : > { %s516_s17 = scalar_lea.hbm %s675_s14, 64  ;;  %s520_s7 = scalar_lea.hbm %s720_s5, 256 }
  0x3a   : > { %p517_p4 = scmp.ne.s32.totalorder %s675_s14, %s516_s17  ;;  %p521_p9 = scmp.lt.u32.totalorder %s675_s14, %s720_s5 }
  0x3b   : > { %p522_p10 = scmp.lt.u32.totalorder %s520_s7, %s516_s17  ;;  %p524_p12 = scmp.lt.u32.totalorder %s516_s17, %s675_s14 }
  0x3c   : > { %p518_p7 = pnand %p517_p4, %p635_p5 }
  0x3d   : > { %p523_p11 = por %p522_p10, %p521_p9 }
  0x3e   : > { %p519_p8 = pneg %p518_p7 }
  0x3f   : > { %p525_p13 = por %p524_p12, %p523_p11 }
  0x41   : > { %p526_p0 = pnand %p525_p13, %p519_p8 }
  0x43   : > { %529 = shalt.err (!%p526_p0)
}
  0x44   : > { %457 = dma.vmem_to_hbm [thread:$0]  (%p635_p5), %s670_s10, 64, %s675_s14, %s323_s15  }
  0x45 PF: > { %p463_p1 = scmp.ge.s32.totalorder %s564_s21, 2  ;;  %s348_s6 = sand.u32 1, %s552_s18  }
  0x46   : > { %s349_s11 = scalar_lea.sflag [#allocation3], %s348_s6 }
  0x47   : > { %p460_p2 = pnand %p463_p1, %p639_p6 }
  0x49   : > { %547 = dma.done.wait (!%p460_p2), %s349_s11, 64  }
  0x4a   : > { %549 = vsyncadd (!%p460_p2), %s349_s11, 4294967232  ;;  %p15_p3 = scmp.ge.s32.totalorder %s622_s24, 6   ;;  %s723_s18 = smov %s556_s19 }
  0x4b   : > { %s724_s19 = smov %s560_s20  ;;  %s725_s20 = smov %s633_s27 }
  0x4c   : > { %s726_s21 = smov %s622_s24  ;;  %17 = sbr.rel (!%p15_p3) target bundleno = 3 (0x3), region = 87 }
  0x53   :  { %354 = vsyncpa [#allocation3], 1 }
  0x54   :  { %356 = vsyncpa [#allocation3 + $0x1], 1 }

</bundles_post_ra>
